<compile_context>
chip_gen: v5e
topology: v5e:2x2
jax: 0.10.0
libtpu: 0.0.40
codegen_flags: <defaults>
</compile_context>

<pallas_src>
import numpy as np
import jax
import jax.numpy as jnp
from jax import lax
from jax.experimental import pallas as pl
from jax.experimental.pallas import tpu as pltpu

# ----------------------------- configuration ----------------------------------
N_BATCH = 2
CIN = 64                      # in_channels
COUT = 32                     # out_channels (== num_groups -> per-channel GroupNorm)
GROUPS = 32
DIN = 4                       # inp spatial extent (D = H = W)
DOUT = 2 * DIN                # upsampled / skip spatial extent
EPS = 1e-5                    # torch GroupNorm default

# padded-slab geometry used inside the kernel
PD = DOUT + 2                 # padded depth  (z)
PH = DOUT + 2                 # padded height (y)
RR = PD * PH                  # rows of the (z_pad, y_pad) grid = 100
ROWS = 128                    # allocated slab rows (8-aligned, room for +-11 row shifts)
BASE = 16                     # row offset of the padded grid inside the slab
WCO = DOUT * COUT             # 256 lanes: (x, channel) of a 32-channel activation
CNT = float(DOUT * DOUT * DOUT)   # interior voxels per channel (GroupNorm count)
SIN = DIN * DIN               # 16 rows (z, y) of the deconv input
SOUT = DOUT * DOUT            # 64 rows (z, y) of the compact output


# --------------------- pin pltpu.roll's shift convention ------------------------
_ROLL_SIGN = [0]


def _probe_roll_sign():
    """One-off probe: does pltpu.roll(x, k) equal np.roll(x, k) or np.roll(x, -k)?"""
    if _ROLL_SIGN[0]:
        return _ROLL_SIGN[0]
    x = np.arange(8 * 128, dtype=np.float32).reshape(8, 128)

    def kern(x_ref, o_ref):
        o_ref[...] = pltpu.roll(x_ref[...], 1, axis=0)

    y = np.asarray(pl.pallas_call(
        kern, out_shape=jax.ShapeDtypeStruct((8, 128), jnp.float32))(x))
    if np.array_equal(y, np.roll(x, 1, axis=0)):
        _ROLL_SIGN[0] = 1
    elif np.array_equal(y, np.roll(x, -1, axis=0)):
        _ROLL_SIGN[0] = -1
    else:
        raise RuntimeError("unexpected pltpu.roll semantics")
    return _ROLL_SIGN[0]


# ------------------------------- fused kernel ----------------------------------
def _up_blocks_kernel(inp_ref, skip_ref, wdec_ref, wb1_ref, wb2_ref, wb3_ref,
                      wb4_ref, gn_ref, scat_ref, sskip_ref, gath_ref,
                      out_ref, slab64, slab_a, slab_b):
    f32 = jnp.float32
    bf16 = jnp.bfloat16
    sgn = _ROLL_SIGN[0] or 1          # trace-time constant from the probe

    # interior-row mask of the 10x10 (z_pad, y_pad) grid: (ROWS, 1) bool, one iota.
    rr = lax.broadcasted_iota(jnp.int32, (ROWS, 1), 0)
    off = rr - BASE
    zp = off // PH
    yp = off % PH
    interior = ((off >= 0) & (off < RR) & (zp >= 1) & (zp <= DOUT)
                & (yp >= 1) & (yp <= DOUT))

    def silu(x):
        return x * jax.nn.sigmoid(x)

    def group_norm(x, idx):
        # num_groups == COUT -> per-channel stats over the DOUT^3 interior voxels.
        # The (x, c) -> c fold is 3 lane-rolls (log-tree over the 8 x blocks); the
        # folded sums land broadcast on every lane, so there is no unfold and no MXU
        # dependency in the GroupNorm at all.
        gamma = gn_ref[2 * idx:2 * idx + 1, :]           # (1, WCO), x-tiled on host
        beta = gn_ref[2 * idx + 1:2 * idx + 2, :]
        xm = jnp.where(interior, x, 0.0)                 # NaN-robust masking
        st = jnp.concatenate(
            [jnp.sum(xm, axis=0, keepdims=True),
             jnp.sum(xm * xm, axis=0, keepdims=True)], axis=0)       # (2, WCO)
        st = st + pltpu.roll(st, 4 * COUT, axis=1)
        st = st + pltpu.roll(st, 2 * COUT, axis=1)
        st = st + pltpu.roll(st, COUT, axis=1)           # per-channel sums, every lane
        mean = st[0:1, :] * (1.0 / CNT)
        ex2 = st[1:2, :] * (1.0 / CNT)
        inv = lax.rsqrt(ex2 - mean * mean + EPS)         # biased variance, as in torch
        a = inv * gamma
        b = beta - mean * a
        return x * a + b

    def banded_conv(src_ref, w_ref, blocks):
        # 3x3x3 conv: the (kd, kh) offset is a sublane roll of the full 128-row slab
        # (aligned; exterior rows are exactly zero so the extra rows are harmless),
        # the kw offset / x zero-padding lives in the x-banded weight.  Tap
        # contributions accumulate in registers -- no scratch-accumulator RMW.
        acc = None
        for h in range(blocks):                          # K-split keeps vregs in check
            c0 = h * WCO
            for kd in range(3):
                for kh in range(3):
                    t = kd * 3 + kh
                    s = (kd - 1) * PH + (kh - 1)
                    x = src_ref[:, c0:c0 + WCO]
                    if s != 0:
                        x = pltpu.roll(x, (sgn * -s) % ROWS, axis=0)
                    acc_t = jnp.dot(x.astype(bf16), w_ref[t, c0:c0 + WCO, :],
                                    preferred_element_type=f32)
                    acc = acc_t if acc is None else acc + acc_t
        return acc

    # ---- 1. ConvTranspose3d(k=2, s=2) + channel-concat with skip ---------------
    x_in = inp_ref[...].astype(bf16)                                   # (16, DIN*CIN)
    up_all = jnp.dot(x_in, wdec_ref[...], preferred_element_type=f32)  # (16, 4*WCO)
    up_stk = jnp.concatenate(
        [up_all[:, k * WCO:(k + 1) * WCO] for k in range(4)], axis=0).astype(bf16)
    slab64[:, 0:WCO] = jnp.dot(scat_ref[...], up_stk,
                               preferred_element_type=f32)             # ch [0, 32)
    slab64[:, WCO:2 * WCO] = jnp.dot(sskip_ref[...], skip_ref[...].astype(bf16),
                                     preferred_element_type=f32)       # ch [32, 64)

    # ---- 2..3. UnetBasicBlock: conv -> GN -> SiLU, twice -----------------------
    slab_a[...] = jnp.where(
        interior, silu(group_norm(banded_conv(slab64, wb1_ref, 2), 0)), 0.0)
    slab_b[...] = jnp.where(
        interior, silu(group_norm(banded_conv(slab_a, wb2_ref, 1), 1)), 0.0)  # y

    # ---- 4..5. UnetResBlock: conv -> GN -> SiLU, conv -> GN, + residual, SiLU --
    slab_a[...] = jnp.where(
        interior, silu(group_norm(banded_conv(slab_b, wb3_ref, 1), 2)), 0.0)
    z = silu(group_norm(banded_conv(slab_a, wb4_ref, 1), 3) + slab_b[...])

    # ---- 6. interior extraction: one 0/1 gather matmul, lane-dense store -------
    out_ref[...] = jnp.dot(gath_ref[...], z,
                           preferred_element_type=f32).astype(out_ref.dtype)


# ------------------------------- wrapper ---------------------------------------
def up_blocks_forward(inp, skip, kp):
    """UpBlocks.forward(inp, skip), NDHWC layout, fully fused in one pallas_call."""
    n = inp.shape[0]
    x2 = inp.reshape(n, SIN, DIN * CIN)        # rows=(z,y), lanes=(x, cin)
    s2 = skip.reshape(n, SOUT, WCO)            # rows=(z,y), lanes=(x, c)
    # NOTE: grid=(N,) "parallel" shards batch items across TensorCores on v7x; on
    # single-TC chips (v5e/v6e) it is a serial loop -- folding both batch items into
    # one grid step there would halve the per-step overhead (not done here).
    out = pl.pallas_call(
        _up_blocks_kernel,
        out_shape=jax.ShapeDtypeStruct((n, SOUT, WCO), jnp.float32),
        grid_spec=pltpu.PrefetchScalarGridSpec(
            num_scalar_prefetch=0,
            grid=(n,),
            in_specs=[
                pl.BlockSpec((None, SIN, DIN * CIN), lambda i: (i, 0, 0)),   # inp
                pl.BlockSpec((None, SOUT, WCO), lambda i: (i, 0, 0)),        # skip
                pl.BlockSpec((DIN * CIN, 4 * WCO), lambda i: (0, 0)),        # deconv W
                pl.BlockSpec((9, 2 * WCO, WCO), lambda i: (0, 0, 0)),        # conv1 (banded)
                pl.BlockSpec((9, WCO, WCO), lambda i: (0, 0, 0)),            # conv2
                pl.BlockSpec((9, WCO, WCO), lambda i: (0, 0, 0)),            # conv3
                pl.BlockSpec((9, WCO, WCO), lambda i: (0, 0, 0)),            # conv4
                pl.BlockSpec((8, WCO), lambda i: (0, 0)),                    # gamma/beta (x-tiled)
                pl.BlockSpec((ROWS, 4 * SIN), lambda i: (0, 0)),             # deconv row-scatter
                pl.BlockSpec((ROWS, SOUT), lambda i: (0, 0)),                # skip row-scatter
                pl.BlockSpec((SOUT, ROWS), lambda i: (0, 0)),                # output gather
            ],
            out_specs=pl.BlockSpec((None, SOUT, WCO), lambda i: (i, 0, 0)),
            scratch_shapes=[
                pltpu.VMEM((ROWS, 2 * WCO), jnp.float32),   # concat(up, skip) slab
                pltpu.VMEM((ROWS, WCO), jnp.float32),       # activation slab A
                pltpu.VMEM((ROWS, WCO), jnp.float32),       # activation slab B (residual)
            ],
        ),
        compiler_params=pltpu.CompilerParams(
            dimension_semantics=("parallel",),
            vmem_limit_bytes=32 * 1024 * 1024,
        ),
    )(x2, s2, kp["wdec"], kp["wb1"], kp["wb2"], kp["wb3"], kp["wb4"],
      kp["gn"], kp["scat"], kp["sskip"], kp["gath"])
    return out.reshape(n, DOUT, DOUT, DOUT, COUT)


# ----------------------- torch-layout -> kernel-layout weights ------------------
def _banded_conv_weight(wc, in_lane, n_in_lanes):
    """Torch Conv3d weight (Co, Ci, 3, 3, 3) -> 9 x-banded matrices (one per (kd,kh)).

    wb[t, in_lane(xi, ci), xo*Co + co] = wc[co, ci, kd, kh, kw]  with xi = xo + kw - 1.
    The conv's x zero-padding is implicit (out-of-range xi is simply dropped).
    """
    wc = np.asarray(wc, np.float32)
    co_n, ci_n = wc.shape[0], wc.shape[1]
    wb = np.zeros((9, n_in_lanes, DOUT * co_n), np.float32)
    for kd in range(3):
        for kh in range(3):
            t = kd * 3 + kh
            for kw in range(3):
                blk = np.transpose(wc[:, :, kd, kh, kw])            # (Ci, Co)
                for xo in range(DOUT):
                    xi = xo + kw - 1
                    if 0 <= xi < DOUT:
                        rows = np.array([in_lane(xi, ci) for ci in range(ci_n)])
                        wb[t, rows, xo * co_n:(xo + 1) * co_n] = blk
    return wb


def _deconv_weight(wt):
    """Torch ConvTranspose3d weight (Ci, Co, 2, 2, 2) -> one (DIN*Ci, 4*DOUT*Co) matrix.

    Column block k = 2*kd + kh holds tap (kd, kh, kw) at lane (2*w + kw)*Co + co.
    """
    wt = np.asarray(wt, np.float32)
    ci_n, co_n = wt.shape[0], wt.shape[1]
    wd = np.zeros((DIN * ci_n, 4 * DOUT * co_n), np.float32)
    for kd in range(2):
        for kh in range(2):
            k = 2 * kd + kh
            for kw in range(2):
                for w in range(DIN):
                    wo = 2 * w + kw
                    wd[w * ci_n:(w + 1) * ci_n,
                       k * DOUT * co_n + wo * co_n:
                       k * DOUT * co_n + (wo + 1) * co_n] = wt[:, :, kd, kh, kw]
    return wd


def _host_scatter_constants():
    """0/1 placement matrices: deconv row-scatter, skip row-scatter, output gather."""
    scat = np.zeros((ROWS, 4 * SIN), np.float32)
    for kd in range(2):
        for kh in range(2):
            k = 2 * kd + kh
            for p in range(SIN):
                zi, yi = p // DIN, p % DIN
                r = BASE + (2 * zi + kd + 1) * PH + (2 * yi + kh + 1)
                scat[r, k * SIN + p] = 1.0
    sskip = np.zeros((ROWS, SOUT), np.float32)
    for i in range(SOUT):
        r = BASE + (i // DOUT + 1) * PH + (i % DOUT + 1)
        sskip[r, i] = 1.0
    return scat, sskip, sskip.T.copy()


def prepare_params(p):
    """Convert torch-layout parameters to the kernel's matmul-friendly layouts."""
    assert GROUPS == COUT, "kernel assumes per-channel GroupNorm (num_groups == out_ch)"
    _probe_roll_sign()   # runs eagerly, before the fused kernel is traced
    cat_lane = lambda x, ci: (x * COUT + ci if ci < COUT
                              else WCO + x * COUT + (ci - COUT))
    out_lane = lambda x, ci: x * COUT + ci
    scat, sskip, gath = _host_scatter_constants()
    gn = np.stack([np.tile(np.asarray(p[k], np.float32), DOUT)
                   for k in ("g1", "b1", "g2", "b2", "g3", "b3", "g4", "b4")])
    return {
        "wdec": jnp.asarray(_deconv_weight(p["wt"]), jnp.bfloat16),
        "wb1": jnp.asarray(_banded_conv_weight(p["w1"], cat_lane, 2 * WCO), jnp.bfloat16),
        "wb2": jnp.asarray(_banded_conv_weight(p["w2"], out_lane, WCO), jnp.bfloat16),
        "wb3": jnp.asarray(_banded_conv_weight(p["w3"], out_lane, WCO), jnp.bfloat16),
        "wb4": jnp.asarray(_banded_conv_weight(p["w4"], out_lane, WCO), jnp.bfloat16),
        "gn": jnp.asarray(gn, jnp.float32),                 # (8, WCO), x-tiled gamma/beta
        "scat": jnp.asarray(scat, jnp.bfloat16),
        "sskip": jnp.asarray(sskip, jnp.bfloat16),
        "gath": jnp.asarray(gath, jnp.float32),
    }


# --------------------------- pure-JAX reference (f32) ---------------------------
def _ref_group_norm(x, gamma, beta):
    n, d, h, w, c = x.shape
    xg = x.reshape(n, d * h * w, GROUPS, c // GROUPS)
    mean = xg.mean(axis=(1, 3), keepdims=True)
    var = ((xg - mean) ** 2).mean(axis=(1, 3), keepdims=True)
    xg = (xg - mean) / jnp.sqrt(var + EPS)
    return (xg.reshape(n, d, h, w, c) * gamma.reshape(1, 1, 1, 1, c)
            + beta.reshape(1, 1, 1, 1, c))


def _ref_conv3(x, wc):
    w = jnp.transpose(wc, (2, 3, 4, 1, 0))                          # (kd,kh,kw,Ci,Co)
    return lax.conv_general_dilated(
        x, w, window_strides=(1, 1, 1), padding=((1, 1),) * 3,
        dimension_numbers=("NDHWC", "DHWIO", "NDHWC"),
        precision=lax.Precision.HIGHEST)


def _ref_deconv(x, wt):
    t = jnp.einsum("nzyxi,ioabc->nzaybxco", x, wt, precision=lax.Precision.HIGHEST)
    n, d = t.shape[0], t.shape[1]
    return t.reshape(n, 2 * d, 2 * d, 2 * d, t.shape[-1])


def _ref_silu(x):
    return x * jax.nn.sigmoid(x)


def up_blocks_reference(inp, skip, p):
    x = jnp.concatenate([_ref_deconv(inp, p["wt"]), skip], axis=-1)
    y = _ref_silu(_ref_group_norm(_ref_conv3(x, p["w1"]), p["g1"], p["b1"]))
    y = _ref_silu(_ref_group_norm(_ref_conv3(y, p["w2"]), p["g2"], p["b2"]))
    z = _ref_silu(_ref_group_norm(_ref_conv3(y, p["w3"]), p["g3"], p["b3"]))
    z = _ref_group_norm(_ref_conv3(z, p["w4"]), p["g4"], p["b4"])
    return _ref_silu(z + y)


# ------------------------------------ main --------------------------------------
if __name__ == "__main__":
    key = jax.random.PRNGKey(0)
    ks = jax.random.split(key, 16)

    inp = jax.random.normal(ks[0], (N_BATCH, DIN, DIN, DIN, CIN), jnp.float32)
    skip = jax.random.normal(ks[1], (N_BATCH, DOUT, DOUT, DOUT, COUT), jnp.float32)

    def w(k, shape, scale=0.05):
        return scale * jax.random.normal(k, shape, jnp.float32)

    torch_params = {
        "wt": w(ks[2], (CIN, COUT, 2, 2, 2)),           # ConvTranspose3d, k=2 s=2
        "w1": w(ks[3], (COUT, 2 * COUT, 3, 3, 3)),      # basic block conv1 (cat input)
        "w2": w(ks[4], (COUT, COUT, 3, 3, 3)),          # basic block conv2
        "w3": w(ks[5], (COUT, COUT, 3, 3, 3)),          # res block conv1
        "w4": w(ks[6], (COUT, COUT, 3, 3, 3)),          # res block conv2
        "g1": 1.0 + 0.1 * jax.random.normal(ks[7], (COUT,), jnp.float32),
        "b1": 0.1 * jax.random.normal(ks[8], (COUT,), jnp.float32),
        "g2": 1.0 + 0.1 * jax.random.normal(ks[9], (COUT,), jnp.float32),
        "b2": 0.1 * jax.random.normal(ks[10], (COUT,), jnp.float32),
        "g3": 1.0 + 0.1 * jax.random.normal(ks[11], (COUT,), jnp.float32),
        "b3": 0.1 * jax.random.normal(ks[12], (COUT,), jnp.float32),
        "g4": 1.0 + 0.1 * jax.random.normal(ks[13], (COUT,), jnp.float32),
        "b4": 0.1 * jax.random.normal(ks[14], (COUT,), jnp.float32),
    }
    kparams = prepare_params(torch_params)

    fwd = jax.jit(up_blocks_forward)
    out = jax.block_until_ready(fwd(inp, skip, kparams))

    assert out.shape == (N_BATCH, DOUT, DOUT, DOUT, COUT), out.shape
    assert bool(jnp.all(jnp.isfinite(out)))

    # validate the fused kernel (bf16 matmuls, f32 accumulation) against pure-JAX f32
    ref = up_blocks_reference(inp, skip, torch_params)
    err = float(jnp.max(jnp.abs(out - ref)))
    assert err < 1.5e-1, f"mismatch vs reference: max|diff| = {err}"
    print("KERNEL_OK")
</pallas_src>

<mosaic_0001>
module attributes {stable_mosaic.version = 11 : i64} {
  func.func @kern(%arg0: memref<8x128xf32, #tpu.memory_space<vmem>>, %arg1: memref<8x128xf32, #tpu.memory_space<vmem>>) attributes {dimension_semantics = [], scalar_prefetch = 0 : i64, scratch_operands = 0 : i64, tpu.core_type = #tpu.core_type<tc>} {
    %c0 = arith.constant 0 : index
    %c0_0 = arith.constant 0 : index
    %0 = vector.load %arg0[%c0, %c0_0] : memref<8x128xf32, #tpu.memory_space<vmem>>, vector<8x128xf32>
    %c1_i32 = arith.constant 1 : i32
    %1 = tpu.dynamic_rotate %0 by %c1_i32 dim 0 : vector<8x128xf32>, i32 -> vector<8x128xf32>
    %c0_1 = arith.constant 0 : index
    %c0_2 = arith.constant 0 : index
    %2 = vector.load %arg1[%c0_1, %c0_2] : memref<8x128xf32, #tpu.memory_space<vmem>>, vector<8x128xf32>
    tpu.vector_store %arg1[%c0_1, %c0_2], %1 {strides = array<i32>} : memref<8x128xf32, #tpu.memory_space<vmem>>, vector<8x128xf32>,
    return
  }
}

</mosaic_0001>

<bundles_post_ra>
// kernel: tpu_custom_call.1
= control target key start
LH: loop header
LB: loop body
LE: loop exit
PB: predicated region body
PF: predicated region fallthrough
CT: control target
= control target key end

     0   :  { %6 = vsyncpa [#allocation3], 0  ;;  %s115_s0 = inlined_call_operand.hbm [shape: f32[8,128], index: 0, kind: input, shape index: {}]   ;;  %s116_s1 = inlined_call_operand.hbm [shape: f32[8,128], index: 1, kind: output, shape index: {}]  }
   0x1   :  { %7 = vsyncpa [#allocation4], 0  ;;  %s13_s8 = sshll.u32 %s115_s0, 4  ;;  %s97_s9 = smov [#allocation2]   ;;  %s14_s8 = int_to_ptr.hbm [resolvable:$true] %s13_s8 }
   0x2   :  { %s15_s10 = sshll.u32 %s97_s9, 4  ;;  %s16_s10 = int_to_ptr.vmem [resolvable:$true] %s15_s10 }
   0x3   :  { %18 = dma.hbm_to_vmem [thread:$0]  %s14_s8, 128, %s16_s10, [#allocation3]  }
   0x4   :  { %93 = dma.done.wait [#allocation3], 128  }
   0x5   :  { %94 = vsyncadd [#allocation3], 4294967168  ;;  %s98_s11 = smov [#allocation5]   ;;  %s33_s15 = sshll.u32 %s116_s1, 4  ;;  %v23_v0 = vld [vmem:[#allocation2] sm:$0xff]  ;;  %s34_s15 = int_to_ptr.hbm [resolvable:$true] %s33_s15 }
   0x6   :  { %s31_s12 = sshll.u32 %s98_s11, 4  ;;  %v24_v1 = vrot.slane %v23_v0, 7  ;;  %s32_s12 = int_to_ptr.vmem [resolvable:$true] %s31_s12 }
   0x8   :  { %25 = vst [vmem:[#allocation5] sm:$0xff] %v24_v1 }
   0x9   :  { %36 = dma.vmem_to_hbm [thread:$0]  %s32_s12, 128, %s34_s15, [#allocation4]  }
   0xa   :  { %95 = dma.done.wait [#allocation4], 128  }
   0xb   :  { %96 = vsyncadd [#allocation4], 4294967168 }
   0xc   :  { %41 = vsyncpa [#allocation3], 1 }
   0xd   :  { %42 = vsyncpa [#allocation4], 1 }

</bundles_post_ra>
